<compile_context>
chip_gen: v7x
topology: tpu7x:2x2x1
jax: 0.10.0
libtpu: 0.0.40
codegen_flags: <defaults>
</compile_context>

<pallas_src>
import functools

import jax
import jax.numpy as jnp
from jax.experimental import pallas as pl
from jax.experimental.pallas import tpu as pltpu


def _round_up(x, m):
    return (x + m - 1) // m * m


# ----------------------------- fused Pallas kernel ---------------------------

def fused_gcn_kernel(a_ref, pool_ref, x_ref, wc_ref, bc_ref,
                     lw1_ref, lb1_ref, lw2_ref, lb2_ref, o_ref):
    """Entire GCN forward; everything stays resident in VMEM.

    a_ref   : (Np, Np)    bf16  normalized adjacency (zero padded)
    pool_ref: (Gp, Np)    bf16  row-normalized mean-pool matrix (zero padded)
    x_ref   : (Np, Hp)    bf16  node features (zero padded)
    wc_ref  : (L, Hp, Hp) bf16  conv weights with eval-mode BN scale folded in
    bc_ref  : (L, 1, Hp)  f32   conv biases with BN folded in
    lw1_ref : (Hp, Hp)    bf16  lin1 weight with BN1 folded in
    lb1_ref : (1, Hp)     f32
    lw2_ref : (Hp, Cp)    bf16  lin2 weight
    lb2_ref : (1, Cp)     f32
    o_ref   : (Gp, Cp)    f32
    """
    num_layers = wc_ref.shape[0]
    h = x_ref[...]                               # bf16 activations (Np, Hp)

    for l in range(num_layers):                  # static unroll (3 layers)
        # X @ W  (MXU, f32 accumulation)
        xw = jnp.dot(h, wc_ref[l], preferred_element_type=jnp.float32)
        # A_hat @ (X W)  -- A read from VMEM here, not hoisted
        agg = jnp.dot(a_ref[...], xw.astype(jnp.bfloat16),
                      preferred_element_type=jnp.float32)
        # bias (folded BN) + ReLU in f32 on the VPU, then single cast to bf16
        h = jnp.maximum(agg + bc_ref[l], 0.0).astype(jnp.bfloat16)

    # global mean pool as (Gp, Np) @ (Np, Hp)
    g = jnp.dot(pool_ref[...], h, preferred_element_type=jnp.float32)

    # lin1 -> BN1 -> ReLU (BN folded into lw1/lb1)
    y = jnp.maximum(
        jnp.dot(g.astype(jnp.bfloat16), lw1_ref[...],
                preferred_element_type=jnp.float32) + lb1_ref[...],
        0.0)

    # dropout(p=0.5, training=False) -> identity in eval mode

    # lin2 (lane-dense f32 store)
    o_ref[...] = (jnp.dot(y.astype(jnp.bfloat16), lw2_ref[...],
                          preferred_element_type=jnp.float32) + lb2_ref[...])


_VMEM = pl.BlockSpec(memory_space=pltpu.MemorySpace.VMEM)


def fused_gcn_call(a_p, pool_p, x_p, wc, bc, lw1, lb1, lw2, lb2):
    g_pad = pool_p.shape[0]
    c_pad = lw2.shape[1]
    return pl.pallas_call(
        fused_gcn_kernel,
        out_shape=jax.ShapeDtypeStruct((g_pad, c_pad), jnp.float32),
        in_specs=[_VMEM] * 9,
        out_specs=_VMEM,
    )(a_p, pool_p, x_p, wc, bc, lw1, lb1, lw2, lb2)


# ---------------------------- glue (plain JAX) --------------------------------

def build_normalized_adjacency_padded(edge_index, num_nodes, n_pad):
    """Dense \\hat{A} = D^{-1/2} (A + I) D^{-1/2}, built directly at padded shape.

    Note: duplicate edges are deduplicated (scatter-set); matches PyG for
    simple graphs without pre-existing self-loops (true for this harness).
    Padded rows/cols stay exactly zero.
    """
    src, dst = edge_index[0], edge_index[1]
    a = jnp.zeros((n_pad, n_pad), dtype=jnp.float32)
    a = a.at[dst, src].set(1.0)                       # message src -> dst
    idx = jnp.arange(n_pad)
    diag = ((idx[:, None] == idx[None, :]) & (idx[None, :] < num_nodes))
    a = a + diag.astype(jnp.float32)                  # self loops on real nodes only
    deg = a.sum(axis=1)
    d_inv_sqrt = jnp.where(deg > 0, 1.0 / jnp.sqrt(deg), 0.0)
    return (d_inv_sqrt[:, None] * a * d_inv_sqrt[None, :]).astype(jnp.bfloat16)


def build_pool_matrix_padded(batch, num_graphs, g_pad, n_pad):
    """Row-normalized mean-pool matrix (Gp, Np); padded rows/cols are zero."""
    n = batch.shape[0]
    batch_p = jnp.full((n_pad,), -1, jnp.int32).at[:n].set(batch)
    onehot = (batch_p[None, :] == jnp.arange(g_pad)[:, None]).astype(jnp.float32)
    counts = jnp.maximum(onehot.sum(axis=1, keepdims=True), 1.0)
    return (onehot / counts).astype(jnp.bfloat16)


def init_params(key, num_node_features, hidden, num_classes, num_layers=3):
    """Deterministic synthetic parameters (same shapes as the torch module)."""
    params = {"convs": [], "bns": []}
    f_in = num_node_features
    eps = 1e-5
    for _ in range(num_layers):
        key, kw = jax.random.split(key)
        w = (jax.random.normal(kw, (f_in, hidden), jnp.float32)
             / jnp.sqrt(jnp.float32(f_in)))
        b = jnp.zeros((1, hidden), jnp.float32)
        params["convs"].append((w, b))
        # BatchNorm: gamma=1, beta=0, running_mean=0, running_var=1 (fresh init)
        gamma = jnp.ones((1, hidden), jnp.float32)
        beta = jnp.zeros((1, hidden), jnp.float32)
        r_mean = jnp.zeros((1, hidden), jnp.float32)
        r_var = jnp.ones((1, hidden), jnp.float32)
        scale = gamma / jnp.sqrt(r_var + eps)
        shift = beta - r_mean * scale
        params["bns"].append((scale, shift))
        f_in = hidden

    key, k1, k2 = jax.random.split(key, 3)
    params["lin1_w"] = (jax.random.normal(k1, (hidden, hidden), jnp.float32)
                        / jnp.sqrt(jnp.float32(hidden)))
    params["lin1_b"] = jnp.zeros((1, hidden), jnp.float32)
    params["bn1_scale"] = jnp.ones((1, hidden), jnp.float32) / jnp.sqrt(1.0 + eps)
    params["bn1_shift"] = jnp.zeros((1, hidden), jnp.float32)
    params["lin2_w"] = (jax.random.normal(k2, (hidden, num_classes), jnp.float32)
                        / jnp.sqrt(jnp.float32(hidden)))
    params["lin2_b"] = jnp.zeros((1, num_classes), jnp.float32)
    return params


def prepare_params(params):
    """ONE-TIME: fold eval-mode BN into weights/biases, zero-pad, stack, cast.

    Hoisted out of the per-call path so the per-forward work is just
    A_hat / pool construction + the fused Pallas kernel.
    """
    hidden = params["lin1_w"].shape[0]
    num_classes = params["lin2_w"].shape[1]
    h_pad = _round_up(hidden, 128)
    f_pad = h_pad                      # input features padded to same width so conv weights stack
    c_pad = _round_up(num_classes, 128)

    wc_list, bc_list = [], []
    for (w, b), (scale, shift) in zip(params["convs"], params["bns"]):
        w_f = w * scale                      # per-output-column BN scale
        b_f = b * scale + shift
        fi = w.shape[0]
        wc_list.append(jnp.zeros((f_pad, h_pad), jnp.float32)
                       .at[:fi, :hidden].set(w_f))
        bc_list.append(jnp.zeros((1, h_pad), jnp.float32)
                       .at[:, :hidden].set(b_f))
    wc = jnp.stack(wc_list).astype(jnp.bfloat16)      # (L, Hp, Hp)
    bc = jnp.stack(bc_list)                           # (L, 1, Hp) f32

    lw1_f = params["lin1_w"] * params["bn1_scale"]
    lb1_f = params["lin1_b"] * params["bn1_scale"] + params["bn1_shift"]
    lw1 = (jnp.zeros((h_pad, h_pad), jnp.float32)
           .at[:hidden, :hidden].set(lw1_f).astype(jnp.bfloat16))
    lb1 = jnp.zeros((1, h_pad), jnp.float32).at[:, :hidden].set(lb1_f)

    lw2 = (jnp.zeros((h_pad, c_pad), jnp.float32)
           .at[:hidden, :num_classes].set(params["lin2_w"]).astype(jnp.bfloat16))
    lb2 = jnp.zeros((1, c_pad), jnp.float32).at[:, :num_classes].set(params["lin2_b"])

    prepared = {"wc": wc, "bc": bc, "lw1": lw1, "lb1": lb1,
                "lw2": lw2, "lb2": lb2}
    return jax.device_put(prepared)


@functools.partial(jax.jit, static_argnames=("num_graphs", "num_classes"))
def gcn_forward(prepared, x, edge_index, batch, num_graphs, num_classes):
    n, f_in = x.shape
    f_pad = prepared["wc"].shape[1]         # static from prepared weights (128)

    # padded sizes: node dim only needs the bf16 sublane multiple (16), not 128
    n_pad = _round_up(max(n, 16), 16)
    g_pad = _round_up(max(num_graphs, 1), 8)

    # built directly at padded shape (no extra pad-copy kernels)
    a_p = build_normalized_adjacency_padded(edge_index, n, n_pad)
    pool_p = build_pool_matrix_padded(batch, num_graphs, g_pad, n_pad)
    x_p = (jnp.zeros((n_pad, f_pad), jnp.bfloat16)
           .at[:n, :f_in].set(x.astype(jnp.bfloat16)))

    out_p = fused_gcn_call(a_p, pool_p, x_p,
                           prepared["wc"], prepared["bc"],
                           prepared["lw1"], prepared["lb1"],
                           prepared["lw2"], prepared["lb2"])
    return out_p[:num_graphs, :num_classes]


# --------------------------------- main ---------------------------------------

if __name__ == "__main__":
    NUM_NODES = 16
    NUM_NODE_FEATURES = 16
    HIDDEN = 32
    NUM_CLASSES = 4
    NUM_GRAPHS = 2
    NUM_LAYERS = 3

    key = jax.random.PRNGKey(0)
    key, kx = jax.random.split(key)

    # node features
    x = jax.random.normal(kx, (NUM_NODES, NUM_NODE_FEATURES), jnp.float32)

    # two ring graphs of 8 nodes each (undirected: both directions listed)
    src, dst = [], []
    for g in range(NUM_GRAPHS):
        base = g * 8
        for i in range(8):
            a, b = base + i, base + (i + 1) % 8
            src += [a, b]
            dst += [b, a]
    edge_index = jnp.array([src, dst], dtype=jnp.int32)

    # graph assignment per node
    batch = jnp.array([0] * 8 + [1] * 8, dtype=jnp.int32)

    params = init_params(key, NUM_NODE_FEATURES, HIDDEN, NUM_CLASSES, NUM_LAYERS)
    prepared = prepare_params(params)      # one-time weight folding / padding

    out = gcn_forward(prepared, x, edge_index, batch, NUM_GRAPHS, NUM_CLASSES)
    out = jax.block_until_ready(out)

    assert out.shape == (NUM_GRAPHS, NUM_CLASSES), out.shape
    assert jnp.all(jnp.isfinite(out))
    print("KERNEL_OK")
</pallas_src>

<mosaic_0001>
module attributes {stable_mosaic.version = 11 : i64} {
  func.func @fused_gcn_kernel(%arg0: memref<16x16xbf16, #tpu.memory_space<vmem>>, %arg1: memref<8x16xbf16, #tpu.memory_space<vmem>>, %arg2: memref<16x128xbf16, #tpu.memory_space<vmem>>, %arg3: memref<3x128x128xbf16, #tpu.memory_space<vmem>>, %arg4: memref<3x1x128xf32, #tpu.memory_space<vmem>>, %arg5: memref<128x128xbf16, #tpu.memory_space<vmem>>, %arg6: memref<1x128xf32, #tpu.memory_space<vmem>>, %arg7: memref<128x128xbf16, #tpu.memory_space<vmem>>, %arg8: memref<1x128xf32, #tpu.memory_space<vmem>>, %arg9: memref<8x128xf32, #tpu.memory_space<vmem>>) attributes {dimension_semantics = [], scalar_prefetch = 0 : i64, scratch_operands = 0 : i64, tpu.core_type = #tpu.core_type<tc>} {
    %c0 = arith.constant 0 : index
    %c0_0 = arith.constant 0 : index
    %0 = vector.load %arg2[%c0, %c0_0] : memref<16x128xbf16, #tpu.memory_space<vmem>>, vector<16x128xbf16>
    %c0_1 = arith.constant 0 : index
    %c0_2 = arith.constant 0 : index
    %c0_3 = arith.constant 0 : index
    %1 = vector.load %arg3[%c0_1, %c0_2, %c0_3] : memref<3x128x128xbf16, #tpu.memory_space<vmem>>, vector<1x128x128xbf16>
    %2 = vector.shape_cast %1 : vector<1x128x128xbf16> to vector<128x128xbf16>
    %cst = arith.constant dense<0.000000e+00> : vector<16x128xf32>
    %3 = tpu.matmul %0, %2, %cst {dimension_numbers = #tpu.dot_dimension_numbers<[1], [0], [0], [1], [0, 0, 1, 1], [], []>} : vector<16x128xbf16>, vector<128x128xbf16>, vector<16x128xf32> -> vector<16x128xf32>
    %c0_4 = arith.constant 0 : index
    %c0_5 = arith.constant 0 : index
    %4 = vector.load %arg0[%c0_4, %c0_5] : memref<16x16xbf16, #tpu.memory_space<vmem>>, vector<16x16xbf16>
    %5 = arith.truncf %3 : vector<16x128xf32> to vector<16x128xbf16>
    %cst_6 = arith.constant dense<0.000000e+00> : vector<16x128xf32>
    %6 = tpu.matmul %4, %5, %cst_6 {dimension_numbers = #tpu.dot_dimension_numbers<[1], [0], [0], [1], [0, 0, 1, 1], [], []>} : vector<16x16xbf16>, vector<16x128xbf16>, vector<16x128xf32> -> vector<16x128xf32>
    %c0_7 = arith.constant 0 : index
    %c0_8 = arith.constant 0 : index
    %c0_9 = arith.constant 0 : index
    %7 = vector.load %arg4[%c0_7, %c0_8, %c0_9] : memref<3x1x128xf32, #tpu.memory_space<vmem>>, vector<1x1x128xf32>
    %8 = vector.shape_cast %7 : vector<1x1x128xf32> to vector<1x128xf32>
    %9 = vector.broadcast %8 : vector<1x128xf32> to vector<16x128xf32>
    %10 = arith.addf %6, %9 : vector<16x128xf32>
    %cst_10 = arith.constant 0.000000e+00 : f32
    %11 = vector.broadcast %cst_10 : f32 to vector<16x128xf32>
    %12 = arith.maximumf %10, %11 : vector<16x128xf32>
    %13 = arith.truncf %12 : vector<16x128xf32> to vector<16x128xbf16>
    %c1 = arith.constant 1 : index
    %c0_11 = arith.constant 0 : index
    %c0_12 = arith.constant 0 : index
    %14 = vector.load %arg3[%c1, %c0_11, %c0_12] : memref<3x128x128xbf16, #tpu.memory_space<vmem>>, vector<1x128x128xbf16>
    %15 = vector.shape_cast %14 : vector<1x128x128xbf16> to vector<128x128xbf16>
    %cst_13 = arith.constant dense<0.000000e+00> : vector<16x128xf32>
    %16 = tpu.matmul %13, %15, %cst_13 {dimension_numbers = #tpu.dot_dimension_numbers<[1], [0], [0], [1], [0, 0, 1, 1], [], []>} : vector<16x128xbf16>, vector<128x128xbf16>, vector<16x128xf32> -> vector<16x128xf32>
    %c0_14 = arith.constant 0 : index
    %c0_15 = arith.constant 0 : index
    %17 = vector.load %arg0[%c0_14, %c0_15] : memref<16x16xbf16, #tpu.memory_space<vmem>>, vector<16x16xbf16>
    %18 = arith.truncf %16 : vector<16x128xf32> to vector<16x128xbf16>
    %cst_16 = arith.constant dense<0.000000e+00> : vector<16x128xf32>
    %19 = tpu.matmul %17, %18, %cst_16 {dimension_numbers = #tpu.dot_dimension_numbers<[1], [0], [0], [1], [0, 0, 1, 1], [], []>} : vector<16x16xbf16>, vector<16x128xbf16>, vector<16x128xf32> -> vector<16x128xf32>
    %c1_17 = arith.constant 1 : index
    %c0_18 = arith.constant 0 : index
    %c0_19 = arith.constant 0 : index
    %20 = vector.load %arg4[%c1_17, %c0_18, %c0_19] : memref<3x1x128xf32, #tpu.memory_space<vmem>>, vector<1x1x128xf32>
    %21 = vector.shape_cast %20 : vector<1x1x128xf32> to vector<1x128xf32>
    %22 = vector.broadcast %21 : vector<1x128xf32> to vector<16x128xf32>
    %23 = arith.addf %19, %22 : vector<16x128xf32>
    %cst_20 = arith.constant 0.000000e+00 : f32
    %24 = vector.broadcast %cst_20 : f32 to vector<16x128xf32>
    %25 = arith.maximumf %23, %24 : vector<16x128xf32>
    %26 = arith.truncf %25 : vector<16x128xf32> to vector<16x128xbf16>
    %c2 = arith.constant 2 : index
    %c0_21 = arith.constant 0 : index
    %c0_22 = arith.constant 0 : index
    %27 = vector.load %arg3[%c2, %c0_21, %c0_22] : memref<3x128x128xbf16, #tpu.memory_space<vmem>>, vector<1x128x128xbf16>
    %28 = vector.shape_cast %27 : vector<1x128x128xbf16> to vector<128x128xbf16>
    %cst_23 = arith.constant dense<0.000000e+00> : vector<16x128xf32>
    %29 = tpu.matmul %26, %28, %cst_23 {dimension_numbers = #tpu.dot_dimension_numbers<[1], [0], [0], [1], [0, 0, 1, 1], [], []>} : vector<16x128xbf16>, vector<128x128xbf16>, vector<16x128xf32> -> vector<16x128xf32>
    %c0_24 = arith.constant 0 : index
    %c0_25 = arith.constant 0 : index
    %30 = vector.load %arg0[%c0_24, %c0_25] : memref<16x16xbf16, #tpu.memory_space<vmem>>, vector<16x16xbf16>
    %31 = arith.truncf %29 : vector<16x128xf32> to vector<16x128xbf16>
    %cst_26 = arith.constant dense<0.000000e+00> : vector<16x128xf32>
    %32 = tpu.matmul %30, %31, %cst_26 {dimension_numbers = #tpu.dot_dimension_numbers<[1], [0], [0], [1], [0, 0, 1, 1], [], []>} : vector<16x16xbf16>, vector<16x128xbf16>, vector<16x128xf32> -> vector<16x128xf32>
    %c2_27 = arith.constant 2 : index
    %c0_28 = arith.constant 0 : index
    %c0_29 = arith.constant 0 : index
    %33 = vector.load %arg4[%c2_27, %c0_28, %c0_29] : memref<3x1x128xf32, #tpu.memory_space<vmem>>, vector<1x1x128xf32>
    %34 = vector.shape_cast %33 : vector<1x1x128xf32> to vector<1x128xf32>
    %35 = vector.broadcast %34 : vector<1x128xf32> to vector<16x128xf32>
    %36 = arith.addf %32, %35 : vector<16x128xf32>
    %cst_30 = arith.constant 0.000000e+00 : f32
    %37 = vector.broadcast %cst_30 : f32 to vector<16x128xf32>
    %38 = arith.maximumf %36, %37 : vector<16x128xf32>
    %39 = arith.truncf %38 : vector<16x128xf32> to vector<16x128xbf16>
    %c0_31 = arith.constant 0 : index
    %c0_32 = arith.constant 0 : index
    %40 = vector.load %arg1[%c0_31, %c0_32] : memref<8x16xbf16, #tpu.memory_space<vmem>>, vector<8x16xbf16>
    %cst_33 = arith.constant dense<0.000000e+00> : vector<8x128xf32>
    %41 = tpu.matmul %40, %39, %cst_33 {dimension_numbers = #tpu.dot_dimension_numbers<[1], [0], [0], [1], [0, 0, 1, 1], [], []>} : vector<8x16xbf16>, vector<16x128xbf16>, vector<8x128xf32> -> vector<8x128xf32>
    %42 = arith.truncf %41 : vector<8x128xf32> to vector<8x128xbf16>
    %c0_34 = arith.constant 0 : index
    %c0_35 = arith.constant 0 : index
    %43 = vector.load %arg5[%c0_34, %c0_35] : memref<128x128xbf16, #tpu.memory_space<vmem>>, vector<128x128xbf16>
    %cst_36 = arith.constant dense<0.000000e+00> : vector<8x128xf32>
    %44 = tpu.matmul %42, %43, %cst_36 {dimension_numbers = #tpu.dot_dimension_numbers<[1], [0], [0], [1], [0, 0, 1, 1], [], []>} : vector<8x128xbf16>, vector<128x128xbf16>, vector<8x128xf32> -> vector<8x128xf32>
    %c0_37 = arith.constant 0 : index
    %c0_38 = arith.constant 0 : index
    %45 = vector.load %arg6[%c0_37, %c0_38] : memref<1x128xf32, #tpu.memory_space<vmem>>, vector<1x128xf32>
    %46 = vector.broadcast %45 : vector<1x128xf32> to vector<8x128xf32>
    %47 = arith.addf %44, %46 : vector<8x128xf32>
    %cst_39 = arith.constant 0.000000e+00 : f32
    %48 = vector.broadcast %cst_39 : f32 to vector<8x128xf32>
    %49 = arith.maximumf %47, %48 : vector<8x128xf32>
    %50 = arith.truncf %49 : vector<8x128xf32> to vector<8x128xbf16>
    %c0_40 = arith.constant 0 : index
    %c0_41 = arith.constant 0 : index
    %51 = vector.load %arg7[%c0_40, %c0_41] : memref<128x128xbf16, #tpu.memory_space<vmem>>, vector<128x128xbf16>
    %cst_42 = arith.constant dense<0.000000e+00> : vector<8x128xf32>
    %52 = tpu.matmul %50, %51, %cst_42 {dimension_numbers = #tpu.dot_dimension_numbers<[1], [0], [0], [1], [0, 0, 1, 1], [], []>} : vector<8x128xbf16>, vector<128x128xbf16>, vector<8x128xf32> -> vector<8x128xf32>
    %c0_43 = arith.constant 0 : index
    %c0_44 = arith.constant 0 : index
    %53 = vector.load %arg8[%c0_43, %c0_44] : memref<1x128xf32, #tpu.memory_space<vmem>>, vector<1x128xf32>
    %54 = vector.broadcast %53 : vector<1x128xf32> to vector<8x128xf32>
    %55 = arith.addf %52, %54 : vector<8x128xf32>
    %c0_45 = arith.constant 0 : index
    %c0_46 = arith.constant 0 : index
    %56 = vector.load %arg9[%c0_45, %c0_46] : memref<8x128xf32, #tpu.memory_space<vmem>>, vector<8x128xf32>
    tpu.vector_store %arg9[%c0_45, %c0_46], %55 {strides = array<i32>} : memref<8x128xf32, #tpu.memory_space<vmem>>, vector<8x128xf32>,
    return
  }
}

</mosaic_0001>

<bundles_post_ra>
// kernel: gcn_forward.1
= control target key start
LH: loop header
LB: loop body
LE: loop exit
PB: predicated region body
PF: predicated region fallthrough
CT: control target
= control target key end

     0   :  { %v1107_v0 = vmov 0.0   ;;  %vm1108_vm0 = vmmov 0   ;;  %vm161_vm1 = vcmask 130048   ;;  %s1377_s3 = inlined_call_operand.vmem [shape: bf16[3,128,128], index: 3, kind: input, shape index: {}]   ;;  %s1378_s2 = inlined_call_operand.vmem [shape: bf16[16,128], index: 2, kind: input, shape index: {}]   ;;  %s1379_s0 = inlined_call_operand.vmem [shape: bf16[16,16], index: 0, kind: input, shape index: {}]   ;;  %s1380_s4 = inlined_call_operand.vmem [shape: f32[3,1,128], index: 4, kind: input, shape index: {}]   ;;  %s1381_s5 = inlined_call_operand.vmem [shape: bf16[128,128], index: 5, kind: input, shape index: {}]   ;;  %s1382_s1 = inlined_call_operand.vmem [shape: bf16[8,16], index: 1, kind: input, shape index: {}]   ;;  %s1383_s7 = inlined_call_operand.vmem [shape: bf16[128,128], index: 7, kind: input, shape index: {}]   ;;  %s1384_s6 = inlined_call_operand.vmem [shape: f32[1,128], index: 6, kind: input, shape index: {}]   ;;  %s1385_s8 = inlined_call_operand.vmem [shape: f32[1,128], index: 8, kind: input, shape index: {}]   ;;  %s1386_s9 = inlined_call_operand.vmem [shape: f32[8,128], index: 9, kind: output, shape index: {}]  }
   0x1   :  { %939 = vmatprep.subr.bf16.mxu0 %v1107_v0  ;;  %v1065_v1 = vld [vmem:[%s1377_s3] sm:$0xff]   ;;  %955 = vmatprep.mubr.msk.bf16.mxu0 %vm1108_vm0, %v1107_v0  ;;  %v1066_v2 = vld [vmem:[%s1377_s3 + $0x8] sm:$0xff]   ;;  %v1067_v3 = vld [vmem:[%s1377_s3 + $0x10] sm:$0xff]  }
   0x2   :  { %965 = vmatprep.subr.bf16.mxu1 %v1107_v0  ;;  %981 = vmatprep.mubr.msk.bf16.mxu1 %vm1108_vm0, %v1107_v0  ;;  %v1068_v4 = vld [vmem:[%s1377_s3 + $0x18] sm:$0xff]   ;;  %v1069_v5 = vld [vmem:[%s1377_s3 + $0x20] sm:$0xff]   ;;  %v1070_v6 = vld [vmem:[%s1377_s3 + $0x28] sm:$0xff]  }
   0x3   :  { %940 = vmatpush3.bf16.msra.mxu0 %v1065_v1  ;;  %v1071_v7 = vld [vmem:[%s1377_s3 + $0x30] sm:$0xff]   ;;  %v1072_v8 = vld [vmem:[%s1377_s3 + $0x38] sm:$0xff]   ;;  %v1073_v9 = vld [vmem:[%s1378_s2] sm:$0xff]  }
   0x4   :  { %941 = vmatprep.subr.bf16.mxu0 %v1107_v0  ;;  %v1075_v10 = vld [vmem:[%s1377_s3 + $0x40] sm:$0xff]   ;;  %v1076_v11 = vld [vmem:[%s1377_s3 + $0x48] sm:$0xff]   ;;  %v1077_v12 = vld [vmem:[%s1377_s3 + $0x50] sm:$0xff]  }
   0x5   :  { %966 = vmatpush3.bf16.msra.mxu1 %v1075_v10  ;;  %v1078_v13 = vld [vmem:[%s1377_s3 + $0x58] sm:$0xff]   ;;  %v1079_v14 = vld [vmem:[%s1377_s3 + $0x60] sm:$0xff]   ;;  %v1080_v15 = vld [vmem:[%s1377_s3 + $0x68] sm:$0xff]  }
   0x6   :  { %967 = vmatprep.subr.bf16.mxu1 %v1107_v0  ;;  %v1229_v21 = vld [vmem:[%s1379_s0] sm:$0xff]   ;;  %v1081_v22 = vld [vmem:[%s1377_s3 + $0x70] sm:$0xff]   ;;  %v1082_v23 = vld [vmem:[%s1377_s3 + $0x78] sm:$0xff]  }
   0x7   :  { %942 = vmatpush3.bf16.msra.mxu0 %v1066_v2  ;;  %v810_v24 = vld [vmem:[%s1380_s4] ss:$0 sm:$0xff]  ;;  %v1084_v35 = vld [vmem:[%s1377_s3 + $0x88] sm:$0xff]   ;;  %v1085_v36 = vld [vmem:[%s1377_s3 + $0x90] sm:$0xff]  }
   0x8   :  { %943 = vmatprep.subr.bf16.mxu0 %v1107_v0  ;;  %v1083_v34 = vld [vmem:[%s1377_s3 + $0x80] sm:$0xff]   ;;  %v1086_v37 = vld [vmem:[%s1377_s3 + $0x98] sm:$0xff]   ;;  %v1088_v39 = vld [vmem:[%s1377_s3 + $0xa8] sm:$0xff]  }
   0x9   :  { %968 = vmatpush3.bf16.msra.mxu1 %v1076_v11  ;;  %v1087_v38 = vld [vmem:[%s1377_s3 + $0xa0] sm:$0xff]   ;;  %v1089_v45 = vld [vmem:[%s1377_s3 + $0xb0] sm:$0xff]   ;;  %v1090_v46 = vld [vmem:[%s1377_s3 + $0xb8] sm:$0xff]  }
   0xa   :  { %969 = vmatprep.subr.bf16.mxu1 %v1107_v0  ;;  %v838_v47 = vld [vmem:[%s1380_s4 + $0x1] ss:$0 sm:$0xff]  ;;  %v865_v62 = vld [vmem:[%s1380_s4 + $0x2] ss:$0 sm:$0xff]  ;;  %v1092_v11 = vld [vmem:[%s1381_s5 + $0x8] sm:$0xff]  }
   0xb   :  { %944 = vmatpush3.bf16.msra.mxu0 %v1067_v3  ;;  %v1091_v10 = vld [vmem:[%s1381_s5] sm:$0xff]  }
   0xc   :  { %945 = vmatprep.subr.bf16.mxu0 %v1107_v0 }
   0xd   :  { %970 = vmatpush3.bf16.msra.mxu1 %v1077_v12  ;;  %v1093_v12 = vld [vmem:[%s1381_s5 + $0x10] sm:$0xff]  }
   0xe   :  { %971 = vmatprep.subr.bf16.mxu1 %v1107_v0 }
   0xf   :  { %946 = vmatpush3.bf16.msra.mxu0 %v1068_v4 }
  0x10   :  { %947 = vmatprep.subr.bf16.mxu0 %v1107_v0 }
  0x11   :  { %972 = vmatpush3.bf16.msra.mxu1 %v1078_v13  ;;  %v1094_v13 = vld [vmem:[%s1381_s5 + $0x18] sm:$0xff]  }
  0x12   :  { %973 = vmatprep.subr.bf16.mxu1 %v1107_v0 }
  0x13   :  { %948 = vmatpush3.bf16.msra.mxu0 %v1069_v5 }
  0x14   :  { %949 = vmatprep.subr.bf16.mxu0 %v1107_v0 }
  0x15   :  { %974 = vmatpush3.bf16.msra.mxu1 %v1079_v14  ;;  %v1095_v14 = vld [vmem:[%s1381_s5 + $0x20] sm:$0xff]  }
  0x16   :  { %975 = vmatprep.subr.bf16.mxu1 %v1107_v0 }
  0x17   :  { %950 = vmatpush3.bf16.msra.mxu0 %v1070_v6 }
  0x18   :  { %951 = vmatprep.subr.bf16.mxu0 %v1107_v0 }
  0x19   :  { %976 = vmatpush3.bf16.msra.mxu1 %v1080_v15  ;;  %v1096_v15 = vld [vmem:[%s1381_s5 + $0x28] sm:$0xff]  }
  0x1a   :  { %977 = vmatprep.subr.bf16.mxu1 %v1107_v0 }
  0x1b   :  { %952 = vmatpush3.bf16.msra.mxu0 %v1071_v7 }
  0x1c   :  { %953 = vmatprep.subr.bf16.mxu0 %v1107_v0 }
  0x1d   :  { %978 = vmatpush3.bf16.msra.mxu1 %v1081_v22  ;;  %v1103_v22 = vld [vmem:[%s1383_s7 + $0x20] sm:$0xff]  }
  0x1e   :  { %979 = vmatprep.subr.bf16.mxu1 %v1107_v0 }
  0x1f   :  { %954 = vmatpush3.bf16.msra.mxu0 %v1072_v8 }
  0x20   :  { %959 = vmatprep.subr.bf16.mxu0 %v1107_v0 }
  0x21   :  { %980 = vmatpush3.bf16.msra.mxu1 %v1082_v23  ;;  %v1104_v23 = vld [vmem:[%s1383_s7 + $0x28] sm:$0xff]  }
  0x22   :  { %956 = vmatmul.mubr.bf16.vlgmr.msra.gmra.mrb[0].mxu0 %v1073_v9  ;;  %991 = vmatprep.subr.bf16.mxu1 %v1107_v0  ;;  %v527_v9 = vld [vmem:[%s1382_s1] sm:$0xf] }
  0x23   :  { %961 = vmatprep.mubr.msk.bf16.mxu0 %vm1108_vm0, %v1107_v0 }
  0xf5   :  { %v139_v16 = vpop.f32.mrb[0].mxu0 }
  0xf6   :  { %v957_v17 = vpop.f32.mrb[1].mxu0 }
  0xf7   :  { %v142_v18 = vpop.f32.mrb[2].mxu0  ;;  %v1098_v17 = vld [vmem:[%s1381_s5 + $0x38] sm:$0xff]  }
  0xf8   :  { %v148_v19 = vpack.c.bf16 %v142_v18, %v139_v16  ;;  %v958_v20 = vpop.f32.mrb[3].mxu0  ;;  %v1097_v16 = vld [vmem:[%s1381_s5 + $0x30] sm:$0xff]   ;;  %v1099_v18 = vld [vmem:[%s1383_s7] sm:$0xff]  }
  0xf9   :  { %v1101_v20 = vld [vmem:[%s1383_s7 + $0x10] sm:$0xff]  }
  0xfa   :  { %960 = vmatpush3.bf16.msra.mxu0 %v148_v19  ;;  %v1100_v19 = vld [vmem:[%s1383_s7 + $0x8] sm:$0xff]  }
  0xfb   :  { %985 = vmatprep.subr.bf16.mxu0 %v1107_v0 }
  0xfd   :  { %962 = vmatmul.mubr.msk.bf16.vlgmr.msra.gmra.mrb[4].mxu0 %vm161_vm1, %v1229_v21 }
  0xfe   :  { %987 = vmatprep.mubr.msk.bf16.mxu0 %vm1108_vm0, %v1107_v0 }
 0x1d0   :  { %v199_v25 = vpop.f32.mrb[4].mxu0 }
 0x1d1   :  { %v200_v26 = vadd.f32 %v810_v24, %v199_v25  ;;  %v963_v27 = vpop.f32.mrb[5].mxu0 }
 0x1d2   :  { %v202_v28 = vpop.f32.mrb[6].mxu0 }
 0x1d3   :  { %v203_v29 = vadd.f32 %v810_v24, %v202_v28  ;;  %v964_v30 = vpop.f32.mrb[7].mxu0  ;;  %v206_v31 = vmax.f32 %v200_v26, 0.0 }
 0x1d4   :  { %v1106_v30 = vld [vmem:[%s1383_s7 + $0x38] sm:$0xff]  }
 0x1d5   :  { %v207_v32 = vmax.f32 %v203_v29, 0.0  ;;  %v1105_v29 = vld [vmem:[%s1383_s7 + $0x30] sm:$0xff]  }
 0x1d7   :  { %v208_v33 = vpack.c.bf16 %v207_v32, %v206_v31  ;;  %v868_v31 = vld [vmem:[%s1384_s6] ss:$0 sm:$0xff] }
 0x1d9   :  { %982 = vmatmul.mubr.bf16.vlgmr.msra.gmra.mrb[0].mxu1 %v208_v33 }
 0x1da   :  { %1007 = vmatprep.mubr.msk.bf16.mxu1 %vm1108_vm0, %v1107_v0  ;;  %992 = vmatpush3.bf16.msra.mxu1 %v1083_v34 }
 0x1db   :  { %993 = vmatprep.subr.bf16.mxu1 %v1107_v0 }
 0x1de   :  { %994 = vmatpush3.bf16.msra.mxu1 %v1084_v35 }
 0x1df   :  { %995 = vmatprep.subr.bf16.mxu1 %v1107_v0 }
 0x1e2   :  { %996 = vmatpush3.bf16.msra.mxu1 %v1085_v36 }
 0x1e3   :  { %997 = vmatprep.subr.bf16.mxu1 %v1107_v0 }
 0x1e6   :  { %998 = vmatpush3.bf16.msra.mxu1 %v1086_v37 }
 0x1e7   :  { %999 = vmatprep.subr.bf16.mxu1 %v1107_v0 }
 0x1ea   :  { %1000 = vmatpush3.bf16.msra.mxu1 %v1087_v38 }
 0x1eb   :  { %1001 = vmatprep.subr.bf16.mxu1 %v1107_v0 }
 0x1ee   :  { %1002 = vmatpush3.bf16.msra.mxu1 %v1088_v39 }
 0x1ef   :  { %1003 = vmatprep.subr.bf16.mxu1 %v1107_v0 }
 0x1f2   :  { %1004 = vmatpush3.bf16.msra.mxu1 %v1089_v45 }
 0x1f3   :  { %1005 = vmatprep.subr.bf16.mxu1 %v1107_v0 }
 0x1f6   :  { %1006 = vmatpush3.bf16.msra.mxu1 %v1090_v46 }
 0x1f7   :  { %1043 = vmatprep.subr.bf16.mxu1 %v1107_v0 }
 0x2ac   :  { %v308_v40 = vpop.f32.mrb[0].mxu1 }
 0x2ad   :  { %v983_v41 = vpop.f32.mrb[1].mxu1 }
 0x2ae   :  { %v311_v42 = vpop.f32.mrb[2].mxu1 }
 0x2af   :  { %v315_v43 = vpack.c.bf16 %v311_v42, %v308_v40  ;;  %v984_v44 = vpop.f32.mrb[3].mxu1 }
 0x2b1   :  { %986 = vmatpush3.bf16.msra.mxu0 %v315_v43 }
 0x2b2   :  { %1011 = vmatprep.subr.bf16.mxu0 %v1107_v0 }
 0x2b4   :  { %988 = vmatmul.mubr.msk.bf16.vlgmr.msra.gmra.mrb[8].mxu0 %vm161_vm1, %v1229_v21 }
 0x2b5   :  { %1013 = vmatprep.mubr.msk.bf16.mxu0 %vm1108_vm0, %v1107_v0 }
 0x387   :  { %v358_v48 = vpop.f32.mrb[8].mxu0 }
 0x388   :  { %v359_v49 = vadd.f32 %v838_v47, %v358_v48  ;;  %v989_v50 = vpop.f32.mrb[9].mxu0 }
 0x389   :  { %v361_v51 = vpop.f32.mrb[10].mxu0 }
 0x38a   :  { %v362_v52 = vadd.f32 %v838_v47, %v361_v51  ;;  %v990_v53 = vpop.f32.mrb[11].mxu0  ;;  %v365_v54 = vmax.f32 %v359_v49, 0.0 }
 0x38c   :  { %v366_v55 = vmax.f32 %v362_v52, 0.0 }
 0x38e   :  { %v367_v56 = vpack.c.bf16 %v366_v55, %v365_v54 }
 0x390   :  { %1008 = vmatmul.mubr.bf16.vlgmr.msra.gmra.mrb[4].mxu1 %v367_v56 }
 0x391   :  { %1059 = vmatprep.mubr.msk.bf16.mxu1 %vm1108_vm0, %v1107_v0  ;;  %1044 = vmatpush3.bf16.msra.mxu1 %v1099_v18 }
 0x392   :  { %1045 = vmatprep.subr.bf16.mxu1 %v1107_v0 }
 0x395   :  { %1046 = vmatpush3.bf16.msra.mxu1 %v1100_v19 }
 0x396   :  { %1047 = vmatprep.subr.bf16.mxu1 %v1107_v0 }
 0x399   :  { %1048 = vmatpush3.bf16.msra.mxu1 %v1101_v20 }
 0x39a   :  { %1049 = vmatprep.subr.bf16.mxu1 %v1107_v0 }
 0x463   :  { %v467_v57 = vpop.f32.mrb[4].mxu1 }
 0x464   :  { %v1009_v58 = vpop.f32.mrb[5].mxu1 }
 0x465   :  { %v470_v59 = vpop.f32.mrb[6].mxu1 }
 0x466   :  { %v474_v60 = vpack.c.bf16 %v470_v59, %v467_v57  ;;  %v1010_v61 = vpop.f32.mrb[7].mxu1 }
 0x468   :  { %1012 = vmatpush3.bf16.msra.mxu0 %v474_v60 }
 0x469   :  { %1017 = vmatprep.subr.bf16.mxu0 %v1107_v0 }
 0x46b   :  { %1014 = vmatmul.mubr.msk.bf16.vlgmr.msra.gmra.mrb[12].mxu0 %vm161_vm1, %v1229_v21  ;;  %v1102_v21 = vld [vmem:[%s1383_s7 + $0x18] sm:$0xff]  }
 0x46c   :  { %1019 = vmatprep.mubr.msk.bf16.mxu0 %vm1108_vm0, %v1107_v0  ;;  %1050 = vmatpush3.bf16.msra.mxu1 %v1102_v21 }
 0x46d   :  { %1051 = vmatprep.subr.bf16.mxu1 %v1107_v0 }
 0x470   :  { %1052 = vmatpush3.bf16.msra.mxu1 %v1103_v22 }
 0x471   :  { %1053 = vmatprep.subr.bf16.mxu1 %v1107_v0 }
 0x474   :  { %1054 = vmatpush3.bf16.msra.mxu1 %v1104_v23 }
 0x475   :  { %1055 = vmatprep.subr.bf16.mxu1 %v1107_v0 }
 0x478   :  { %1056 = vmatpush3.bf16.msra.mxu1 %v1105_v29 }
 0x479   :  { %1057 = vmatprep.subr.bf16.mxu1 %v1107_v0 }
 0x47c   :  { %1058 = vmatpush3.bf16.msra.mxu1 %v1106_v30 }
 0x53e   :  { %v517_v63 = vpop.f32.mrb[12].mxu0 }
 0x53f   :  { %v518_v1 = vadd.f32 %v865_v62, %v517_v63  ;;  %v1015_v2 = vpop.f32.mrb[13].mxu0 }
 0x540   :  { %v520_v3 = vpop.f32.mrb[14].mxu0 }
 0x541   :  { %v521_v4 = vadd.f32 %v865_v62, %v520_v3  ;;  %v1016_v5 = vpop.f32.mrb[15].mxu0  ;;  %v524_v6 = vmax.f32 %v518_v1, 0.0 }
 0x543   :  { %v525_v7 = vmax.f32 %v521_v4, 0.0 }
 0x545   :  { %v526_v8 = vpack.c.bf16 %v525_v7, %v524_v6 }
 0x547   :  { %1018 = vmatpush3.bf16.msra.mxu0 %v526_v8 }
 0x548   :  { %1023 = vmatprep.subr.bf16.mxu0 %v1107_v0 }
 0x54a   :  { %1020 = vmatmul.mubr.msk.bf16.vlgmr.msra.gmra.mrb[16].mxu0 %vm161_vm1, %v527_v9 }
 0x54b   :  { %1024 = vmatpush3.bf16.msra.mxu0 %v1091_v10  ;;  %1039 = vmatprep.mubr.msk.bf16.mxu0 %vm1108_vm0, %v1107_v0 }
 0x54c   :  { %1025 = vmatprep.subr.bf16.mxu0 %v1107_v0 }
 0x54f   :  { %1026 = vmatpush3.bf16.msra.mxu0 %v1092_v11 }
 0x550   :  { %1027 = vmatprep.subr.bf16.mxu0 %v1107_v0 }
 0x553   :  { %1028 = vmatpush3.bf16.msra.mxu0 %v1093_v12 }
 0x554   :  { %1029 = vmatprep.subr.bf16.mxu0 %v1107_v0 }
 0x557   :  { %1030 = vmatpush3.bf16.msra.mxu0 %v1094_v13 }
 0x558   :  { %1031 = vmatprep.subr.bf16.mxu0 %v1107_v0 }
 0x55b   :  { %1032 = vmatpush3.bf16.msra.mxu0 %v1095_v14 }
 0x55c   :  { %1033 = vmatprep.subr.bf16.mxu0 %v1107_v0 }
 0x55f   :  { %1034 = vmatpush3.bf16.msra.mxu0 %v1096_v15 }
 0x560   :  { %1035 = vmatprep.subr.bf16.mxu0 %v1107_v0 }
 0x563   :  { %1036 = vmatpush3.bf16.msra.mxu0 %v1097_v16 }
 0x564   :  { %1037 = vmatprep.subr.bf16.mxu0 %v1107_v0  ;;  %v877_v0 = vld [vmem:[%s1385_s8] ss:$0 sm:$0xff] }
 0x567   :  { %1038 = vmatpush3.bf16.msra.mxu0 %v1098_v17 }
 0x61d   :  { %v565_v24 = vpop.f32.mrb[16].mxu0 }
 0x61e   :  { %v571_v25 = vpack.c.bf16 %v565_v24, %v565_v24  ;;  %v1021_v26 = vpop.f32.mrb[17].mxu0 }
 0x61f   :  { %v568_v27 = vpop.f32.mrb[18].mxu0 }
 0x620   :  { %v1022_v28 = vpop.f32.mrb[19].mxu0  ;;  %1040 = vmatmul.mubr.bf16.vlgmr.msra.gmra.mrb[20].mxu0 %v571_v25 }
 0x6f3   :  { %v677_v32 = vpop.f32.mrb[20].mxu0 }
 0x6f4   :  { %v678_v33 = vadd.f32 %v868_v31, %v677_v32  ;;  %v1041_v34 = vpop.f32.mrb[21].mxu0 }
 0x6f5   :  { %v680_v35 = vpop.f32.mrb[22].mxu0 }
 0x6f6   :  { %v683_v36 = vmax.f32 %v678_v33, 0.0  ;;  %v1042_v37 = vpop.f32.mrb[23].mxu0 }
 0x6f8   :  { %v684_v38 = vpack.c.bf16 %v683_v36, %v683_v36 }
 0x6fa   :  { %1060 = vmatmul.mubr.bf16.vlgmr.msra.gmra.mrb[8].mxu1 %v684_v38 }
 0x7cd   :  { %v790_v39 = vpop.f32.mrb[8].mxu1 }
 0x7ce   :  { %v791_v40 = vadd.f32 %v877_v0, %v790_v39  ;;  %v1061_v41 = vpop.f32.mrb[9].mxu1 }
 0x7cf   :  { %v793_v42 = vpop.f32.mrb[10].mxu1 }
 0x7d0   :  { %796 = vst [vmem:[%s1386_s9] sm:$0xff] %v791_v40  ;;  %v1062_v43 = vpop.f32.mrb[11].mxu1 }

</bundles_post_ra>
